<compile_context>
chip_gen: v6e
topology: v6e:2x2x1
jax: 0.10.0
libtpu: 0.0.40
codegen_flags: <defaults>
</compile_context>

<pallas_src>
import functools

import jax
import jax.numpy as jnp
from jax import lax
from jax.experimental import pallas as pl
from jax.experimental.pallas import tpu as pltpu

_LANE = 128


# ---------------------------------------------------------------------------
# Tiling plan (generation-aware VMEM budget)
# ---------------------------------------------------------------------------
def _round_up(x: int, m: int) -> int:
    return ((x + m - 1) // m) * m


def _vmem_capacity_bytes() -> int:
    """Physical VMEM per TensorCore; fall back to v7x's 64 MiB (the smallest)."""
    try:
        cap = getattr(pltpu.get_tpu_info(), "vmem_capacity_bytes", None)
        if cap:
            return int(cap)
    except Exception:
        pass
    return 64 * 1024 * 1024


def _plan(nc: int, hw: int, feat_itemsize: int, n_resident_nc_blocks: int,
          max_tk=None):
    """Pick the K tile (tk), padded H*W extent, grid length, and vmem limit.

    tk is the largest multiple of 128 such that two pipeline buffers of the
    (nc, tk) feature tile plus the resident (nc, nc) f32 blocks (counted
    double-buffered, conservatively) fit within ~60% of physical VMEM.
    """
    cap = _vmem_capacity_bytes()
    budget = int(cap * 0.6)                      # headroom for compiler scratch
    resident = n_resident_nc_blocks * 2 * nc * nc * 4
    feat_budget = max(budget - resident, 2 * nc * _LANE * feat_itemsize)
    tk_cap = (feat_budget // 2) // (nc * feat_itemsize)
    tk_cap = max(_LANE, (tk_cap // _LANE) * _LANE)
    if max_tk is not None:
        tk_cap = min(tk_cap, max(_LANE, (int(max_tk) // _LANE) * _LANE))
    hw_lane = _round_up(hw, _LANE)
    tk = min(tk_cap, hw_lane)
    hw_pad = _round_up(hw_lane, tk)              # zero-pad so tk divides K extent
    n_k = hw_pad // tk
    need = resident + 2 * nc * tk * feat_itemsize + (4 << 20)
    vmem_limit = int(min(cap, max(need, 32 << 20)))
    return tk, hw_pad, n_k, vmem_limit


def _prep_features(x, compute_dtype, hw_pad):
    """NCHW -> (N*C, H*W) features in compute_dtype, zero-padded to hw_pad."""
    a, b, c, d = x.shape
    nc, hw = a * b, c * d
    feats = x.reshape(nc, hw).astype(compute_dtype)
    if hw_pad != hw:
        feats = jnp.pad(feats, ((0, 0), (0, hw_pad - hw)))
    return feats


# ---------------------------------------------------------------------------
# Kernels (G accumulated directly in the resident output block; no scratch)
# ---------------------------------------------------------------------------
def _gram_kernel(feat_ref, g_ref, *, inv_norm):
    """G += f_k . f_k^T over the tiled H*W axis; normalize on the last step."""
    k = pl.program_id(0)

    @pl.when(k == 0)
    def _():
        g_ref[...] = jnp.zeros_like(g_ref)

    f = feat_ref[...]  # compute dtype (bf16 by default) into the MXU
    g_ref[...] += lax.dot_general(
        f, f,
        dimension_numbers=(((1,), (1,)), ((), ())),  # contract lane axis of both
        preferred_element_type=jnp.float32,
    )

    @pl.when(k == pl.num_programs(0) - 1)
    def _():
        g_ref[...] = g_ref[...] * inv_norm


def _style_loss_kernel(feat_ref, target_ref, g_ref, loss_ref, *,
                       inv_norm, inv_count):
    """Tiled gram accumulation + MSE against the resident target gram."""
    k = pl.program_id(0)

    @pl.when(k == 0)
    def _():
        g_ref[...] = jnp.zeros_like(g_ref)

    f = feat_ref[...]
    g_ref[...] += lax.dot_general(
        f, f,
        dimension_numbers=(((1,), (1,)), ((), ())),
        preferred_element_type=jnp.float32,
    )

    @pl.when(k == pl.num_programs(0) - 1)
    def _():
        g = g_ref[...] * inv_norm
        g_ref[...] = g
        diff = g - target_ref[...]
        loss_ref[0, 0] = jnp.sum(diff * diff) * inv_count


# ---------------------------------------------------------------------------
# Wrappers
# ---------------------------------------------------------------------------
def gram_matrix(x, *, compute_dtype=jnp.bfloat16, max_tk=None):
    """Pallas gram matrix: x is NCHW, returns (N*C, N*C) float32."""
    a, b, c, d = x.shape
    nc, hw = a * b, c * d
    itemsize = jnp.dtype(compute_dtype).itemsize
    tk, hw_pad, n_k, vmem_limit = _plan(nc, hw, itemsize, 1, max_tk)
    feats = _prep_features(x, compute_dtype, hw_pad)
    inv_norm = 1.0 / float(nc * hw)  # original hw; zero padding adds nothing

    return pl.pallas_call(
        functools.partial(_gram_kernel, inv_norm=inv_norm),
        out_shape=jax.ShapeDtypeStruct((nc, nc), jnp.float32),
        grid_spec=pltpu.PrefetchScalarGridSpec(
            num_scalar_prefetch=0,
            grid=(n_k,),
            in_specs=[pl.BlockSpec((nc, tk), lambda k: (0, k))],
            out_specs=pl.BlockSpec((nc, nc), lambda k: (0, 0)),
        ),
        compiler_params=pltpu.CompilerParams(
            dimension_semantics=("arbitrary",),
            vmem_limit_bytes=vmem_limit),
        cost_estimate=pl.CostEstimate(
            flops=2 * nc * nc * hw_pad,
            transcendentals=0,
            bytes_accessed=nc * hw_pad * itemsize + nc * nc * 4),
    )(feats)


class StyleLoss:
    """JAX/Pallas equivalent of the PyTorch StyleLoss module."""

    def __init__(self, target_feature, *, compute_dtype=jnp.bfloat16,
                 max_tk=None):
        self.compute_dtype = compute_dtype
        self.max_tk = max_tk
        # target gram is computed once at init (detached constant), kept f32.
        self.target = gram_matrix(
            target_feature, compute_dtype=compute_dtype, max_tk=max_tk)

    def forward(self, x):
        a, b, c, d = x.shape
        nc, hw = a * b, c * d
        itemsize = jnp.dtype(self.compute_dtype).itemsize
        # 2 resident (nc, nc) f32 blocks: G output + target gram input.
        tk, hw_pad, n_k, vmem_limit = _plan(nc, hw, itemsize, 2, self.max_tk)
        feats = _prep_features(x, self.compute_dtype, hw_pad)
        inv_norm = 1.0 / float(nc * hw)
        inv_count = 1.0 / float(nc * nc)

        g, loss = pl.pallas_call(
            functools.partial(
                _style_loss_kernel, inv_norm=inv_norm, inv_count=inv_count),
            out_shape=(
                jax.ShapeDtypeStruct((nc, nc), jnp.float32),
                jax.ShapeDtypeStruct((1, 1), jnp.float32),
            ),
            grid_spec=pltpu.PrefetchScalarGridSpec(
                num_scalar_prefetch=0,
                grid=(n_k,),
                in_specs=[
                    # features: K-tiled, double-buffered by BlockSpec.
                    pl.BlockSpec((nc, tk), lambda k: (0, k)),
                    # target gram: constant index_map -> resident, single DMA.
                    pl.BlockSpec((nc, nc), lambda k: (0, 0)),
                ],
                out_specs=(
                    # G accumulated in place (resident across the K axis).
                    pl.BlockSpec((nc, nc), lambda k: (0, 0)),
                    # scalar loss via SMEM (avoid masked (1,1) VMEM store).
                    pl.BlockSpec(memory_space=pltpu.MemorySpace.SMEM),
                ),
            ),
            compiler_params=pltpu.CompilerParams(
                dimension_semantics=("arbitrary",),
                vmem_limit_bytes=vmem_limit),
            cost_estimate=pl.CostEstimate(
                flops=2 * nc * nc * hw_pad,
                transcendentals=0,
                bytes_accessed=(nc * hw_pad * itemsize
                                + 2 * nc * nc * 4 + 4)),
        )(feats, self.target)

        self.G = g
        self.loss = loss[0, 0]
        return x  # module returns its input unchanged


# ---------------------------------------------------------------------------
# Reference (pure JAX) for sanity check
# ---------------------------------------------------------------------------
def _gram_ref(x, feat_dtype):
    a, b, c, d = x.shape
    f = x.reshape(a * b, c * d).astype(feat_dtype)
    g = lax.dot_general(f, f, dimension_numbers=(((1,), (1,)), ((), ())),
                        preferred_element_type=jnp.float32)
    return g / float(a * b * c * d)


if __name__ == "__main__":
    key = jax.random.PRNGKey(0)
    k1, k2, k3, k4 = jax.random.split(key, 4)

    # --- Test 1: NCHW batch=2, channels=4, spatial=16x16 (single K step, bf16).
    target_feature = jax.random.normal(k1, (2, 4, 16, 16), dtype=jnp.float32)
    x = jax.random.normal(k2, (2, 4, 16, 16), dtype=jnp.float32)

    module = StyleLoss(target_feature)
    out = jax.block_until_ready(module.forward(x))
    loss = jax.block_until_ready(module.loss)

    # Matched-precision reference (bf16 features, f32 accumulation).
    g_ref = _gram_ref(x, jnp.bfloat16)
    t_ref = _gram_ref(target_feature, jnp.bfloat16)
    loss_ref = jnp.mean((g_ref - t_ref) ** 2)
    assert out.shape == x.shape and jnp.allclose(out, x)
    assert jnp.allclose(module.G, g_ref, atol=1e-4, rtol=1e-4)
    assert jnp.allclose(loss, loss_ref, atol=1e-6, rtol=1e-3)

    # Loose check against full-f32 semantics (bf16 features, f32 accumulate).
    g_f32 = _gram_ref(x, jnp.float32)
    loss_f32 = jnp.mean((g_f32 - _gram_ref(target_feature, jnp.float32)) ** 2)
    assert jnp.allclose(module.G, g_f32, atol=2e-3, rtol=2e-2)
    assert jnp.allclose(loss, loss_f32, atol=1e-6, rtol=5e-2)

    # --- Test 2: ragged H*W (30x30 = 900 -> zero-padded) + forced multi K-step
    # accumulation path (max_tk=256 => 4 grid steps).
    tf2 = jax.random.normal(k3, (1, 8, 30, 30), dtype=jnp.float32)
    x2 = jax.random.normal(k4, (1, 8, 30, 30), dtype=jnp.float32)
    m2 = StyleLoss(tf2, max_tk=256)
    out2 = jax.block_until_ready(m2.forward(x2))
    loss2 = jax.block_until_ready(m2.loss)

    g2_ref = _gram_ref(x2, jnp.bfloat16)
    loss2_ref = jnp.mean((g2_ref - _gram_ref(tf2, jnp.bfloat16)) ** 2)
    assert jnp.allclose(out2, x2)
    assert jnp.allclose(m2.G, g2_ref, atol=2e-4, rtol=2e-4)
    assert jnp.allclose(loss2, loss2_ref, atol=1e-6, rtol=2e-3)

    # --- Test 3: pure f32 compute path matches the f32 reference tightly.
    m3 = StyleLoss(target_feature, compute_dtype=jnp.float32)
    out3 = jax.block_until_ready(m3.forward(x))
    loss3 = jax.block_until_ready(m3.loss)
    assert jnp.allclose(out3, x)
    assert jnp.allclose(m3.G, g_f32, atol=1e-5, rtol=1e-5)
    assert jnp.allclose(loss3, loss_f32, atol=1e-6, rtol=1e-5)

    print("KERNEL_OK")
</pallas_src>

<mosaic_0001>
module attributes {stable_mosaic.version = 11 : i64} {
  func.func @_gram_kernel(%arg0: i32, %arg1: memref<8x256xbf16, #tpu.memory_space<vmem>>, %arg2: memref<8x8xf32, #tpu.memory_space<vmem>>) attributes {dimension_semantics = [#tpu.dimension_semantics<arbitrary>], iteration_bounds = array<i64: 1>, scalar_prefetch = 0 : i64, scratch_operands = 0 : i64, tpu.core_type = #tpu.core_type<tc>, window_params = [{transform_indices = @transform_0, window_bounds = array<i64: 8, 256>}, {pipeline_mode = #tpu.pipeline_mode<synchronous>, transform_indices = @transform_1, window_bounds = array<i64: 8, 8>}]} {
    %c0_i32 = arith.constant 0 : i32
    %0 = arith.cmpi eq, %arg0, %c0_i32 : i32
    %1 = arith.extui %0 : i1 to i32
    %c0_i32_0 = arith.constant 0 : i32
    %2 = arith.cmpi ne, %1, %c0_i32_0 : i32
    scf.if %2 {
      %cst_8 = arith.constant 0.000000e+00 : f32
      %11 = vector.broadcast %cst_8 : f32 to vector<8x8xf32>
      %c0_9 = arith.constant 0 : index
      %c0_10 = arith.constant 0 : index
      %12 = vector.load %arg2[%c0_9, %c0_10] : memref<8x8xf32, #tpu.memory_space<vmem>>, vector<8x8xf32>
      tpu.vector_store %arg2[%c0_9, %c0_10], %11 {strides = array<i32>} : memref<8x8xf32, #tpu.memory_space<vmem>>, vector<8x8xf32>,
    } else {
    }
    %c0 = arith.constant 0 : index
    %c0_1 = arith.constant 0 : index
    %3 = vector.load %arg1[%c0, %c0_1] : memref<8x256xbf16, #tpu.memory_space<vmem>>, vector<8x256xbf16>
    %c0_2 = arith.constant 0 : index
    %c0_3 = arith.constant 0 : index
    %4 = vector.load %arg2[%c0_2, %c0_3] : memref<8x8xf32, #tpu.memory_space<vmem>>, vector<8x8xf32>
    %cst = arith.constant dense<0.000000e+00> : vector<8x8xf32>
    %5 = tpu.matmul %3, %3, %cst {dimension_numbers = #tpu.dot_dimension_numbers<[1], [1], [0], [0], [0, 0, 1, 0], [], []>} : vector<8x256xbf16>, vector<8x256xbf16>, vector<8x8xf32> -> vector<8x8xf32>
    %6 = arith.addf %4, %5 : vector<8x8xf32>
    %c0_4 = arith.constant 0 : index
    %c0_5 = arith.constant 0 : index
    %7 = vector.load %arg2[%c0_4, %c0_5] : memref<8x8xf32, #tpu.memory_space<vmem>>, vector<8x8xf32>
    tpu.vector_store %arg2[%c0_4, %c0_5], %6 {strides = array<i32>} : memref<8x8xf32, #tpu.memory_space<vmem>>, vector<8x8xf32>,
    %c0_i32_6 = arith.constant 0 : i32
    %8 = arith.cmpi eq, %arg0, %c0_i32_6 : i32
    %9 = arith.extui %8 : i1 to i32
    %c0_i32_7 = arith.constant 0 : i32
    %10 = arith.cmpi ne, %9, %c0_i32_7 : i32
    scf.if %10 {
      %c0_8 = arith.constant 0 : index
      %c0_9 = arith.constant 0 : index
      %11 = vector.load %arg2[%c0_8, %c0_9] : memref<8x8xf32, #tpu.memory_space<vmem>>, vector<8x8xf32>
      %cst_10 = arith.constant 4.8828125E-4 : f32
      %12 = vector.broadcast %cst_10 : f32 to vector<8x8xf32>
      %13 = arith.mulf %11, %12 : vector<8x8xf32>
      %c0_11 = arith.constant 0 : index
      %c0_12 = arith.constant 0 : index
      %14 = vector.load %arg2[%c0_11, %c0_12] : memref<8x8xf32, #tpu.memory_space<vmem>>, vector<8x8xf32>
      tpu.vector_store %arg2[%c0_11, %c0_12], %13 {strides = array<i32>} : memref<8x8xf32, #tpu.memory_space<vmem>>, vector<8x8xf32>,
    } else {
    }
    return
  }
  func.func @transform_0(%arg0: i32) -> (i32, i32) {
    %c0_i32 = arith.constant 0 : i32
    %c0_i32_0 = arith.constant 0 : i32
    return %c0_i32, %arg0 : i32, i32
  }
  func.func @transform_1(%arg0: i32) -> (i32, i32) {
    %c0_i32 = arith.constant 0 : i32
    %c0_i32_0 = arith.constant 0 : i32
    %c0_i32_1 = arith.constant 0 : i32
    return %c0_i32, %c0_i32_0 : i32, i32
  }
}

</mosaic_0001>

<bundles_post_ra>
// kernel: tpu_custom_call.1
= control target key start
LH: loop header
LB: loop body
LE: loop exit
PB: predicated region body
PF: predicated region fallthrough
CT: control target
= control target key end

     0   :  { %6 = vsyncpa [#allocation3], 0  ;;  %s174_s0 = inlined_call_operand.hbm [shape: bf16[8,256], index: 0, kind: input, shape index: {}]   ;;  %s175_s1 = inlined_call_operand.hbm [shape: f32[8,8], index: 1, kind: output, shape index: {}]  }
   0x1   :  { %7 = vsyncpa [#allocation4], 0  ;;  %s152_s6 = smov [#allocation2]  }
   0x2   :  { %s14_s7 = sshll.u32 %s152_s6, 4  ;;  %s15_s7 = int_to_ptr.vmem [resolvable:$true] %s14_s7 }
   0x3   :  { %s116_s8 = scalar_lea.vmem %s15_s7, 128  ;;  %p121_p1 = scmp.lt.s32.totalorder %s15_s7, %s15_s7 }
   0x4   :  { %p117_p0 = scmp.ne.s32.totalorder %s15_s7, %s116_s8  ;;  %p122_p2 = scmp.lt.s32.totalorder %s116_s8, %s116_s8 }
   0x6   :  { %p123_p3 = por %p122_p2, %p121_p1 }
   0x8   :  { %p124_p4 = pnand %p123_p3, %p117_p0 }
   0xa   :  { %127 = shalt.err (!%p124_p4)
}
   0xb   :  { %17 = dma.hbm_to_vmem [thread:$0]  %s174_s0, 128, %s15_s7, [#allocation3]  }
   0xc   :  { %148 = dma.done.wait [#allocation3], 128  }
   0xd   :  { %149 = vsyncadd [#allocation3], 4294967168  ;;  %vm26_vm0 = vcmask 64512   ;;  %v153_v0 = vmov 0.0   ;;  %v28_v1 = vld [vmem:[#allocation2] sm:$0xff]  ;;  %s154_s0 = smov [#allocation5]  }
   0xe   :  { %27 = vst.msk [vmem:[#allocation5] sm:$0xff] %vm26_vm0, %v153_v0  ;;  %v102_v2 = vcombine.high %v28_v1, %v28_v1  ;;  %v101_v3 = vcombine.low %v28_v1, %v28_v1  ;;  %s92_s11 = sshll.u32 %s154_s0, 4  ;;  %s93_s11 = int_to_ptr.vmem [resolvable:$true] %s92_s11 }
   0xf   :  { %s128_s12 = scalar_lea.vmem %s93_s11, 128  ;;  %p133_p6 = scmp.lt.s32.totalorder %s93_s11, %s93_s11 }
  0x10   :  { %51 = vmatprep.subr.bf16.mxu0 %v102_v2  ;;  %69 = vmatprep.mubr.bf16.mxu0 %v102_v2  ;;  %p129_p5 = scmp.ne.s32.totalorder %s93_s11, %s128_s12  ;;  %p134_p7 = scmp.lt.s32.totalorder %s128_s12, %s128_s12 }
  0x11   :  { %52 = vmatpush1.bf16.xpose.msra.mxu0 %v101_v3 }
  0x12   :  { %p135_p8 = por %p134_p7, %p133_p6 }
  0x14   :  { %p136_p9 = pnand %p135_p8, %p129_p5 }
  0x15   :  { %v29_v4 = vld [vmem:[#allocation5] sm:$0xff] }
  0x18   :  { %70 = vmatmul.mubr.bf16.vlgmr.msra.gmra.mxu0 %v101_v3 }
  0xd8   :  { %v71_v5 = vpop.f32.mrf.mxu0 }
  0xd9   :  { %v77_v6 = vadd.f32 %v71_v5, %v29_v4 }
  0xda   :  { %v73_v7 = vpop.f32.mrf.mxu0 }
  0xdb   :  { %79 = vst.msk [vmem:[#allocation5] sm:$0xff] %vm26_vm0, %v77_v6 }
  0xdc   :  { %v74_v8 = vpop.f32.mrf.mxu0 }
  0xde   :  { %v75_v9 = vpop.f32.mrf.mxu0 }
  0xe2   :  { %v83_v10 = vld [vmem:[#allocation5] sm:$0xff] }
  0xe3   :  { %v84_v11 = vmul.f32 0.00048828125, %v83_v10 }
  0xe5   :  { %85 = vst.msk [vmem:[#allocation5] sm:$0xff] %vm26_vm0, %v84_v11 }
  0xe6   :  { %139 = shalt.err (!%p136_p9)
}
  0xe7   :  { %95 = dma.vmem_to_hbm [thread:$0]  %s93_s11, 128, %s175_s1, [#allocation4]  }
  0xe8   :  { %150 = dma.done.wait [#allocation4], 128  }
  0xe9   :  { %151 = vsyncadd [#allocation4], 4294967168 }
  0xea   :  { %99 = vsyncpa [#allocation3], 1 }
  0xeb   :  { %100 = vsyncpa [#allocation4], 1 }

</bundles_post_ra>
